<compile_context>
chip_gen: v7x
topology: tpu7x:2x2x1
jax: 0.10.0
libtpu: 0.0.40
codegen_flags: <defaults>
</compile_context>

<pallas_src>
import jax
import jax.numpy as jnp
import numpy as np
from jax import lax
from jax.experimental import pallas as pl
from jax.experimental.pallas import tpu as pltpu

INPUT_SIZE = 64
HIDDEN = 32
N_LAYERS = 2

# Packed-slab layout (rows x 128 lanes, all block starts 8-row aligned):
#   rows [0, 64)                 : fc1 W^T            (In, H)   in lanes [0, H)
#   row  64                      : fc1 bias           (1, H)    in lanes [0, H)
#   per layer l (block of 72 rows starting at 72 + 72*l):
#     rows [base, base+64)       : fused GRU weight   (2H, 4H)
#     row  base+64               : fused GRU bias     (1, 4H)
FC_BLOCK_ROWS = ((INPUT_SIZE + 1 + 7) // 8) * 8          # 72
GRU_BLOCK_ROWS = ((2 * HIDDEN + 1 + 7) // 8) * 8         # 72
SLAB_ROWS = FC_BLOCK_ROWS + N_LAYERS * GRU_BLOCK_ROWS    # 216
SLAB_COLS = 4 * HIDDEN                                   # 128


# ----------------------- fused fc1 + ReLU + GRU-over-time ---------------------
def encoder_kernel(xseq_ref, h0_ref, slab_ref, out_ref, hid_ref):
    H = HIDDEN
    T = xseq_ref.shape[0]

    # Static carve-up of the resident weight slab (all slice starts 8-aligned).
    fc_w = slab_ref[0:INPUT_SIZE, 0:H]                                  # (In, H)
    fc_b = slab_ref[INPUT_SIZE:INPUT_SIZE + 1, 0:H]                     # (1, H)
    gru_w, gru_b = [], []
    for l in range(N_LAYERS):
        base = FC_BLOCK_ROWS + l * GRU_BLOCK_ROWS
        gru_w.append(slab_ref[base:base + 2 * H, :])                    # (2H, 4H)
        gru_b.append(slab_ref[base + 2 * H:base + 2 * H + 1, :])        # (1, 4H)

    def step(t, hs):
        x = xseq_ref[pl.ds(t, 1), :]                                    # (1, In)
        x = jnp.maximum(
            jnp.dot(x, fc_w, preferred_element_type=jnp.float32) + fc_b, 0.0)

        new_hs = []
        for l in range(N_LAYERS):
            h = hs[l]                                                   # (1, H)
            xh = jnp.concatenate([x, h], axis=1)                        # (1, 2H)
            # Single fused MXU push per layer; lane groups = [r | z | in_n | hn_n].
            g = jnp.dot(xh, gru_w[l],
                        preferred_element_type=jnp.float32) + gru_b[l]  # (1, 4H)
            r = jax.nn.sigmoid(g[:, 0:H])
            z = jax.nn.sigmoid(g[:, H:2 * H])
            n = jnp.tanh(g[:, 2 * H:3 * H] + r * g[:, 3 * H:4 * H])
            h = (1.0 - z) * n + z * h
            new_hs.append(h)
            x = h                                                       # feed next layer

        out_ref[pl.ds(t, 1), :] = x                                     # GRU output @ t
        return tuple(new_hs)

    h0 = tuple(h0_ref[l:l + 1, :] for l in range(N_LAYERS))
    h_final = lax.fori_loop(0, T, step, h0, unroll=T <= 16)
    hid_ref[...] = jnp.concatenate(h_final, axis=0)                     # one (L, H) store


@jax.jit
def _encoder_seq_call(x_seq, h0_flat, slab):
    T = x_seq.shape[0]
    vmem = pltpu.MemorySpace.VMEM
    return pl.pallas_call(
        encoder_kernel,
        out_shape=(jax.ShapeDtypeStruct((T, HIDDEN), jnp.float32),       # output seq
                   jax.ShapeDtypeStruct((N_LAYERS, HIDDEN), jnp.float32)),  # new hidden
        in_specs=[pl.BlockSpec(memory_space=vmem),     # x_seq
                  pl.BlockSpec(memory_space=vmem),     # h0
                  pl.BlockSpec(memory_space=vmem)],    # packed weight slab
        out_specs=(pl.BlockSpec(memory_space=vmem),
                   pl.BlockSpec(memory_space=vmem)),
        input_output_aliases={1: 1},                   # h0 -> new hidden (in-place)
    )(x_seq, h0_flat, slab)


def encoder_seq(slab, x_seq, hidden):
    """x_seq: (T, INPUT_SIZE), hidden: (L, 1, H) -> (out (T,1,H), hidden (L,1,H))."""
    L, _, H = hidden.shape
    out, hid = _encoder_seq_call(x_seq, hidden.reshape(L, H), slab)
    return out.reshape(-1, 1, H), hid.reshape(L, 1, H)


def encoder_forward(slab, inp, hidden):
    """Exact module semantics: forward(input, hidden) for a single time step."""
    out, hid = encoder_seq(slab, inp.reshape(1, INPUT_SIZE), hidden)
    return out, hid                                   # out: (1, 1, H), hid: (L, 1, H)


# ----------------------- host-side one-time weight packing --------------------
def pack_params(params):
    """Pre-transpose, gate-fuse and concatenate every parameter into one slab."""
    H, In, L = HIDDEN, INPUT_SIZE, N_LAYERS
    slab = np.zeros((SLAB_ROWS, SLAB_COLS), np.float32)

    fc_w = np.asarray(params["fc1_w"], np.float32)                  # (H, In)
    fc_b = np.asarray(params["fc1_b"], np.float32)                  # (H,)
    slab[0:In, 0:H] = fc_w.T
    slab[In, 0:H] = fc_b

    for l in range(L):
        wih = np.asarray(params["wih"][l], np.float32)              # (3H, H) rows r|z|n
        whh = np.asarray(params["whh"][l], np.float32)              # (3H, H)
        bih = np.asarray(params["bih"][l], np.float32)              # (3H,)
        bhh = np.asarray(params["bhh"][l], np.float32)              # (3H,)

        w = np.zeros((2 * H, 4 * H), np.float32)
        w[0:H,     0:H]         = wih[0:H].T          # r: W_ir
        w[H:2 * H, 0:H]         = whh[0:H].T          # r: W_hr
        w[0:H,     H:2 * H]     = wih[H:2 * H].T      # z: W_iz
        w[H:2 * H, H:2 * H]     = whh[H:2 * H].T      # z: W_hz
        w[0:H,     2 * H:3 * H] = wih[2 * H:3 * H].T  # n: W_in (input part)
        w[H:2 * H, 3 * H:4 * H] = whh[2 * H:3 * H].T  # n: W_hn (hidden part)

        b = np.zeros((4 * H,), np.float32)
        b[0:H]         = bih[0:H] + bhh[0:H]
        b[H:2 * H]     = bih[H:2 * H] + bhh[H:2 * H]
        b[2 * H:3 * H] = bih[2 * H:3 * H]
        b[3 * H:4 * H] = bhh[2 * H:3 * H]

        base = FC_BLOCK_ROWS + l * GRU_BLOCK_ROWS
        slab[base:base + 2 * H, :] = w
        slab[base + 2 * H, :] = b

    return jnp.asarray(slab)


# ------------------------------ pure-JAX reference -----------------------------
def encoder_reference_seq(params, x_seq, hidden):
    H = HIDDEN
    P = jax.lax.Precision.HIGHEST
    h = [hidden[l] for l in range(N_LAYERS)]
    outs = []
    for t in range(x_seq.shape[0]):
        x = jnp.maximum(
            jnp.dot(x_seq[t:t + 1], params["fc1_w"].T, precision=P) + params["fc1_b"], 0.0)
        for l in range(N_LAYERS):
            gi = jnp.dot(x, params["wih"][l].T, precision=P) + params["bih"][l]
            gh = jnp.dot(h[l], params["whh"][l].T, precision=P) + params["bhh"][l]
            r = jax.nn.sigmoid(gi[:, :H] + gh[:, :H])
            z = jax.nn.sigmoid(gi[:, H:2 * H] + gh[:, H:2 * H])
            n = jnp.tanh(gi[:, 2 * H:] + r * gh[:, 2 * H:])
            h[l] = (1.0 - z) * n + z * h[l]
            x = h[l]
        outs.append(x)
    return jnp.stack(outs, axis=0), jnp.stack(h, axis=0)    # (T,1,H), (L,1,H)


def init_params(key):
    ks = jax.random.split(key, 6)
    s = 0.1
    return {
        "fc1_w": s * jax.random.normal(ks[0], (HIDDEN, INPUT_SIZE), jnp.float32),
        "fc1_b": s * jax.random.normal(ks[1], (HIDDEN,), jnp.float32),
        # PyTorch GRU layout: weight_ih/hh_l{l} = (3H, H), gate row order (r, z, n).
        "wih": s * jax.random.normal(ks[2], (N_LAYERS, 3 * HIDDEN, HIDDEN), jnp.float32),
        "whh": s * jax.random.normal(ks[3], (N_LAYERS, 3 * HIDDEN, HIDDEN), jnp.float32),
        "bih": s * jax.random.normal(ks[4], (N_LAYERS, 3 * HIDDEN), jnp.float32),
        "bhh": s * jax.random.normal(ks[5], (N_LAYERS, 3 * HIDDEN), jnp.float32),
    }


if __name__ == "__main__":
    key = jax.random.PRNGKey(0)
    pkey, xkey = jax.random.split(key)
    params = init_params(pkey)
    slab = pack_params(params)

    T = 8
    x_seq = jax.random.normal(xkey, (T, INPUT_SIZE), jnp.float32)
    hidden0 = jnp.zeros((N_LAYERS, 1, HIDDEN), jnp.float32)       # Encoder.initHidden()

    # Reference (computed first, before any aliased kernel call).
    out_ref_seq, hid_ref_seq = encoder_reference_seq(params, x_seq, hidden0)
    out_ref_1, hid_ref_1 = encoder_reference_seq(params, x_seq[0:1], hidden0)

    # Single-step call == exact torch forward(input, hidden) semantics.
    out1, hid1 = encoder_forward(slab, x_seq[0:1], hidden0)
    # Amortized multi-step call: whole sequence in one kernel launch.
    out_seq, hid_seq = encoder_seq(slab, x_seq, hidden0)
    jax.block_until_ready((out1, hid1, out_seq, hid_seq))

    np.testing.assert_allclose(np.asarray(out1), np.asarray(out_ref_1), atol=2e-5, rtol=2e-5)
    np.testing.assert_allclose(np.asarray(hid1), np.asarray(hid_ref_1), atol=2e-5, rtol=2e-5)
    np.testing.assert_allclose(np.asarray(out_seq), np.asarray(out_ref_seq), atol=2e-5, rtol=2e-5)
    np.testing.assert_allclose(np.asarray(hid_seq), np.asarray(hid_ref_seq), atol=2e-5, rtol=2e-5)

    print("KERNEL_OK")
</pallas_src>

<mosaic_0001>
module attributes {stable_mosaic.version = 11 : i64} {
  func.func @encoder_kernel(%arg0: memref<1x64xf32, #tpu.memory_space<vmem>>, %arg1: memref<2x32xf32, #tpu.memory_space<vmem>>, %arg2: memref<216x128xf32, #tpu.memory_space<vmem>>, %arg3: memref<1x32xf32, #tpu.memory_space<vmem>>, %arg4: memref<2x32xf32, #tpu.memory_space<vmem>>) attributes {dimension_semantics = [], scalar_prefetch = 0 : i64, scratch_operands = 0 : i64, tpu.core_type = #tpu.core_type<tc>} {
    %c0 = arith.constant 0 : index
    %c0_0 = arith.constant 0 : index
    %0 = vector.load %arg2[%c0, %c0_0] : memref<216x128xf32, #tpu.memory_space<vmem>>, vector<64x32xf32>
    %c64 = arith.constant 64 : index
    %c0_1 = arith.constant 0 : index
    %1 = vector.load %arg2[%c64, %c0_1] : memref<216x128xf32, #tpu.memory_space<vmem>>, vector<1x32xf32>
    %c72 = arith.constant 72 : index
    %c0_2 = arith.constant 0 : index
    %2 = vector.load %arg2[%c72, %c0_2] : memref<216x128xf32, #tpu.memory_space<vmem>>, vector<64x128xf32>
    %c136 = arith.constant 136 : index
    %c0_3 = arith.constant 0 : index
    %3 = vector.load %arg2[%c136, %c0_3] : memref<216x128xf32, #tpu.memory_space<vmem>>, vector<1x128xf32>
    %c144 = arith.constant 144 : index
    %c0_4 = arith.constant 0 : index
    %4 = vector.load %arg2[%c144, %c0_4] : memref<216x128xf32, #tpu.memory_space<vmem>>, vector<64x128xf32>
    %c208 = arith.constant 208 : index
    %c0_5 = arith.constant 0 : index
    %5 = vector.load %arg2[%c208, %c0_5] : memref<216x128xf32, #tpu.memory_space<vmem>>, vector<1x128xf32>
    %c0_6 = arith.constant 0 : index
    %c0_7 = arith.constant 0 : index
    %6 = vector.load %arg1[%c0_6, %c0_7] : memref<2x32xf32, #tpu.memory_space<vmem>>, vector<1x32xf32>
    %c1 = arith.constant 1 : index
    %c0_8 = arith.constant 0 : index
    %7 = vector.load %arg1[%c1, %c0_8] : memref<2x32xf32, #tpu.memory_space<vmem>>, vector<1x32xf32>
    %c0_i32 = arith.constant 0 : i32
    %8 = arith.index_cast %c0_i32 : i32 to index
    %c0_9 = arith.constant 0 : index
    %9 = vector.load %arg0[%8, %c0_9] : memref<1x64xf32, #tpu.memory_space<vmem>>, vector<1x64xf32>
    %cst = arith.constant dense<0.000000e+00> : vector<1x32xf32>
    %10 = tpu.matmul %9, %0, %cst {dimension_numbers = #tpu.dot_dimension_numbers<[1], [0], [0], [1], [0, 0, 1, 1], [], []>} : vector<1x64xf32>, vector<64x32xf32>, vector<1x32xf32> -> vector<1x32xf32>
    %11 = arith.addf %10, %1 : vector<1x32xf32>
    %cst_10 = arith.constant 0.000000e+00 : f32
    %12 = vector.broadcast %cst_10 : f32 to vector<1x32xf32>
    %13 = arith.maximumf %11, %12 : vector<1x32xf32>
    %14 = tpu.concatenate %13, %6 in 1 : vector<1x32xf32>, vector<1x32xf32> -> vector<1x64xf32>
    %cst_11 = arith.constant dense<0.000000e+00> : vector<1x128xf32>
    %15 = tpu.matmul %14, %2, %cst_11 {dimension_numbers = #tpu.dot_dimension_numbers<[1], [0], [0], [1], [0, 0, 1, 1], [], []>} : vector<1x64xf32>, vector<64x128xf32>, vector<1x128xf32> -> vector<1x128xf32>
    %16 = arith.addf %15, %3 : vector<1x128xf32>
    %17 = vector.extract_strided_slice %16 {offsets = [0, 0], sizes = [1, 32], strides = [1, 1]} : vector<1x128xf32> to vector<1x32xf32>
    %18 = arith.negf %17 : vector<1x32xf32>
    %19 = math.exp %18 : vector<1x32xf32>
    %cst_12 = arith.constant 1.000000e+00 : f32
    %20 = vector.broadcast %cst_12 : f32 to vector<1x32xf32>
    %21 = arith.addf %20, %19 : vector<1x32xf32>
    %22 = arith.divf %20, %21 : vector<1x32xf32>
    %23 = vector.extract_strided_slice %16 {offsets = [0, 32], sizes = [1, 32], strides = [1, 1]} : vector<1x128xf32> to vector<1x32xf32>
    %24 = arith.negf %23 : vector<1x32xf32>
    %25 = math.exp %24 : vector<1x32xf32>
    %cst_13 = arith.constant 1.000000e+00 : f32
    %26 = vector.broadcast %cst_13 : f32 to vector<1x32xf32>
    %27 = arith.addf %26, %25 : vector<1x32xf32>
    %28 = arith.divf %26, %27 : vector<1x32xf32>
    %29 = vector.extract_strided_slice %16 {offsets = [0, 64], sizes = [1, 32], strides = [1, 1]} : vector<1x128xf32> to vector<1x32xf32>
    %30 = vector.extract_strided_slice %16 {offsets = [0, 96], sizes = [1, 32], strides = [1, 1]} : vector<1x128xf32> to vector<1x32xf32>
    %31 = arith.mulf %22, %30 : vector<1x32xf32>
    %32 = arith.addf %29, %31 : vector<1x32xf32>
    %33 = math.tanh %32 : vector<1x32xf32>
    %cst_14 = arith.constant 1.000000e+00 : f32
    %34 = vector.broadcast %cst_14 : f32 to vector<1x32xf32>
    %35 = arith.subf %34, %28 : vector<1x32xf32>
    %36 = arith.mulf %35, %33 : vector<1x32xf32>
    %37 = arith.mulf %28, %6 : vector<1x32xf32>
    %38 = arith.addf %36, %37 : vector<1x32xf32>
    %39 = tpu.concatenate %38, %7 in 1 : vector<1x32xf32>, vector<1x32xf32> -> vector<1x64xf32>
    %cst_15 = arith.constant dense<0.000000e+00> : vector<1x128xf32>
    %40 = tpu.matmul %39, %4, %cst_15 {dimension_numbers = #tpu.dot_dimension_numbers<[1], [0], [0], [1], [0, 0, 1, 1], [], []>} : vector<1x64xf32>, vector<64x128xf32>, vector<1x128xf32> -> vector<1x128xf32>
    %41 = arith.addf %40, %5 : vector<1x128xf32>
    %42 = vector.extract_strided_slice %41 {offsets = [0, 0], sizes = [1, 32], strides = [1, 1]} : vector<1x128xf32> to vector<1x32xf32>
    %43 = arith.negf %42 : vector<1x32xf32>
    %44 = math.exp %43 : vector<1x32xf32>
    %cst_16 = arith.constant 1.000000e+00 : f32
    %45 = vector.broadcast %cst_16 : f32 to vector<1x32xf32>
    %46 = arith.addf %45, %44 : vector<1x32xf32>
    %47 = arith.divf %45, %46 : vector<1x32xf32>
    %48 = vector.extract_strided_slice %41 {offsets = [0, 32], sizes = [1, 32], strides = [1, 1]} : vector<1x128xf32> to vector<1x32xf32>
    %49 = arith.negf %48 : vector<1x32xf32>
    %50 = math.exp %49 : vector<1x32xf32>
    %cst_17 = arith.constant 1.000000e+00 : f32
    %51 = vector.broadcast %cst_17 : f32 to vector<1x32xf32>
    %52 = arith.addf %51, %50 : vector<1x32xf32>
    %53 = arith.divf %51, %52 : vector<1x32xf32>
    %54 = vector.extract_strided_slice %41 {offsets = [0, 64], sizes = [1, 32], strides = [1, 1]} : vector<1x128xf32> to vector<1x32xf32>
    %55 = vector.extract_strided_slice %41 {offsets = [0, 96], sizes = [1, 32], strides = [1, 1]} : vector<1x128xf32> to vector<1x32xf32>
    %56 = arith.mulf %47, %55 : vector<1x32xf32>
    %57 = arith.addf %54, %56 : vector<1x32xf32>
    %58 = math.tanh %57 : vector<1x32xf32>
    %cst_18 = arith.constant 1.000000e+00 : f32
    %59 = vector.broadcast %cst_18 : f32 to vector<1x32xf32>
    %60 = arith.subf %59, %53 : vector<1x32xf32>
    %61 = arith.mulf %60, %58 : vector<1x32xf32>
    %62 = arith.mulf %53, %7 : vector<1x32xf32>
    %63 = arith.addf %61, %62 : vector<1x32xf32>
    %64 = arith.index_cast %c0_i32 : i32 to index
    %c0_19 = arith.constant 0 : index
    %65 = vector.load %arg3[%64, %c0_19] : memref<1x32xf32, #tpu.memory_space<vmem>>, vector<1x32xf32>
    tpu.vector_store %arg3[%64, %c0_19], %63 {strides = array<i32>} : memref<1x32xf32, #tpu.memory_space<vmem>>, vector<1x32xf32>,
    %c1_i32 = arith.constant 1 : i32
    %66 = tpu.concatenate %38, %63 in 0 : vector<1x32xf32>, vector<1x32xf32> -> vector<2x32xf32>
    %c0_20 = arith.constant 0 : index
    %c0_21 = arith.constant 0 : index
    %67 = vector.load %arg4[%c0_20, %c0_21] : memref<2x32xf32, #tpu.memory_space<vmem>>, vector<2x32xf32>
    tpu.vector_store %arg4[%c0_20, %c0_21], %66 {strides = array<i32>} : memref<2x32xf32, #tpu.memory_space<vmem>>, vector<2x32xf32>,
    return
  }
}

</mosaic_0001>

<bundles_post_ra>
// kernel: _encoder_seq_call.1
= control target key start
LH: loop header
LB: loop body
LE: loop exit
PB: predicated region body
PF: predicated region fallthrough
CT: control target
= control target key end

     0   :  { %10 = vsyncpa [#allocation3], 0  ;;  %s785_s0 = inlined_call_operand.vmem [shape: f32[1,64], index: 0, kind: input, shape index: {}]   ;;  %s786_s1 = inlined_call_operand.hbm [shape: f32[2,32], index: 1, kind: input, shape index: {}, may-alias: {1,4}]   ;;  %s787_s2 = inlined_call_operand.hbm [shape: f32[216,128], index: 2, kind: input, shape index: {}]   ;;  %s788_s3 = inlined_call_operand.hbm [shape: f32[1,32], index: 3, kind: output, shape index: {0}]   ;;  %s789_s4 = inlined_call_operand.hbm [shape: f32[2,32], index: 4, kind: output, shape index: {1}, may-alias: {1,4}]  }
   0x1   :  { %11 = vsyncpa [#allocation6], 0 }
   0x2   :  { %12 = vsyncpa [#allocation4], 0 }
   0x3   :  { %13 = vsyncpa [#allocation9], 0  ;;  %s651_s15 = smov [#allocation2]   ;;  %s652_s17 = smov [#allocation5]  }
   0x4   :  { %s22_s16 = sshll.u32 %s651_s15, 4  ;;  %s31_s18 = sshll.u32 %s652_s17, 4  ;;  %s23_s16 = int_to_ptr.vmem [resolvable:$true] %s22_s16  ;;  %s688_s18 = int_to_ptr.vmem [resolvable:$true] %s31_s18 }
   0x5   :  { %s555_s21 = scalar_lea.hbm %s786_s1, 32 }
   0x6   :  { %p556_p0 = scmp.ne.s32.totalorder %s786_s1, %s555_s21  ;;  %p559_p1 = scmp.lt.u32.totalorder %s555_s21, %s786_s1 }
   0x8   :  { %p561_p2 = pnand %p559_p1, %p556_p0 }
   0xa   :  { %564 = shalt.err (!%p561_p2)
}
   0xb   :  { %s565_s26 = scalar_lea.vmem %s23_s16, 32  ;;  %p570_p4 = scmp.lt.s32.totalorder %s23_s16, %s23_s16 }
   0xc   :  { %p566_p3 = scmp.ne.s32.totalorder %s23_s16, %s565_s26  ;;  %p571_p5 = scmp.lt.s32.totalorder %s565_s26, %s565_s26 }
   0xe   :  { %p572_p6 = por %p571_p5, %p570_p4 }
  0x10   :  { %p573_p7 = pnand %p572_p6, %p566_p3 }
  0x12   :  { %576 = shalt.err (!%p573_p7)
}
  0x13   :  { %25 = dma.hbm_to_vmem [thread:$0]  %s786_s1, 32, %s23_s16, [#allocation3]  }
  0x14   :  { %s577_s5 = scalar_lea.hbm %s787_s2, 3456 }
  0x15   :  { %p578_p8 = scmp.ne.s32.totalorder %s787_s2, %s577_s5  ;;  %p581_p9 = scmp.lt.u32.totalorder %s577_s5, %s787_s2 }
  0x17   :  { %p583_p10 = pnand %p581_p9, %p578_p8 }
  0x19   :  { %586 = shalt.err (!%p583_p10)
}
  0x1a   :  { %s587_s10 = scalar_lea.vmem %s688_s18, 3456  ;;  %p592_p12 = scmp.lt.s32.totalorder %s688_s18, %s688_s18 }
  0x1b   :  { %p588_p11 = scmp.ne.s32.totalorder %s688_s18, %s587_s10  ;;  %p593_p13 = scmp.lt.s32.totalorder %s587_s10, %s587_s10 }
  0x1d   :  { %p594_p0 = por %p593_p13, %p592_p12 }
  0x1f   :  { %p595_p1 = pnand %p594_p0, %p588_p11 }
  0x21   :  { %598 = shalt.err (!%p595_p1)
}
  0x22   :  { %s653_s1 = smov 128   ;;  %s654_s11 = smov 8  }
  0x23   :  { %37 = dma.hbm_to_vmem [thread:$0]  %s787_s2, 3456, %s688_s18, [#allocation6], %s653_s1, %s653_s1, %s654_s11  }
  0x24   :  { %643 = dma.done.wait [#allocation3], 32  }
  0x25   :  { %644 = vsyncadd [#allocation3], 4294967264 }
  0x26   :  { %645 = dma.done.wait [#allocation6], 3456  }
  0x27   :  { %646 = vsyncadd [#allocation6], 4294963840  ;;  %v655_v0 = vmov 0.0|0.0   ;;  %vm656_vm0 = vmmov 0   ;;  %v657_v1 = vmov 0.0   ;;  %v44_v2 = vld [vmem:[#allocation5] sm:$0xff] }
  0x28   :  { %495 = vmatprep.subr.bf16.mxu0 %v655_v0  ;;  %454 = vmatprep.mubr.msk.f32.mxu0 %vm656_vm0, %v657_v1  ;;  %v45_v3 = vld [vmem:[#allocation5 + $0x8] sm:$0xff]  ;;  %v46_v4 = vld [vmem:[#allocation5 + $0x10] sm:$0xff]  ;;  %v47_v6 = vld [vmem:[#allocation5 + $0x18] sm:$0xff]  ;;  %s658_s2 = smov 32   ;;  %vm74_vm1 = vcmask 523264   ;;  %vm153_vm2 = vcmask 261120  }
  0x29   :  { %507 = vmatprep.subr.bf16.mxu1 %v655_v0  ;;  %473 = vmatprep.mubr.msk.f32.mxu1 %vm656_vm0, %v657_v1  ;;  %v496_v5 = vpack.c.bf16 %v45_v3, %v44_v2  ;;  %v48_v7 = vld [vmem:[#allocation5 + $0x20] sm:$0xff]  ;;  %v499_v8 = vpack.c.bf16 %v47_v6, %v46_v4  ;;  %v71_v9 = vld [vmem:[#allocation2] sm:$0x1]  ;;  %v53_v10 = vld [vmem:[#allocation5 + $0x48] sm:$0xff]  ;;  %s660_s16 = smov 96   ;;  %vm368_vm3 = vcmask 1040384  }
  0x2a   :  { %v54_v11 = vld [vmem:[#allocation5 + $0x50] sm:$0xff]  ;;  %v49_v12 = vld [vmem:[#allocation5 + $0x28] sm:$0xff]  ;;  %150 = vrot.lane.b32.xlu0 %v71_v9, %s658_s2  ;;  %v55_v14 = vld [vmem:[#allocation5 + $0x58] sm:$0xff]  ;;  %s661_s17 = smov [#allocation7]   ;;  %vm364_vm4 = vcmask 253952   ;;  %s662_s19 = smov [#allocation8]  }
  0x2b   :  { %497 = vmatpush3.bf16.msra.mxu0 %v496_v5  ;;  %v508_v13 = vpack.c.bf16 %v54_v11, %v53_v10  ;;  %v56_v15 = vld [vmem:[#allocation5 + $0x60] sm:$0xff]  ;;  %v502_v17 = vpack.c.bf16 %v49_v12, %v48_v7  ;;  %v57_v18 = vld [vmem:[#allocation5 + $0x68] sm:$0xff]  ;;  %v58_v19 = vld [vmem:[#allocation5 + $0x70] sm:$0xff]  ;;  %s382_s18 = sshll.u32 %s661_s17, 4  ;;  %s392_s20 = sshll.u32 %s662_s19, 4  ;;  %vm374_vm5 = vcmask 254976   ;;  %s383_s18 = int_to_ptr.vmem [resolvable:$true] %s382_s18  ;;  %s753_s20 = int_to_ptr.vmem [resolvable:$true] %s392_s20 }
  0x2c   :  { %498 = vmatprep.subr.bf16.mxu0 %v655_v0  ;;  %v511_v16 = vpack.c.bf16 %v56_v15, %v55_v14  ;;  %v50_v20 = vld [vmem:[#allocation5 + $0x30] sm:$0xff]  ;;  %v51_v21 = vld [vmem:[#allocation5 + $0x38] sm:$0xff]  ;;  %v514_v22 = vpack.c.bf16 %v58_v19, %v57_v18  ;;  %v60_v26 = vld [vmem:[#allocation5 + $0x80] sm:$0xff]  ;;  %s599_s21 = scalar_lea.vmem %s383_s18, 16  ;;  %s603_s22 = scalar_lea.vmem %s383_s18, 32 }
  0x2d   :  { %509 = vmatpush3.bf16.msra.mxu1 %v508_v13  ;;  %v505_v23 = vpack.c.bf16 %v51_v21, %v50_v20  ;;  %v73_v24 = vld [vmem:[%s785_s0] sm:$0x1]  ;;  %v52_v28 = vld [vmem:[#allocation5 + $0x40] sm:$0x1]  ;;  %v61_v35 = vld [vmem:[#allocation5 + $0x88] sm:$0x1]  ;;  %p600_p2 = scmp.ne.s32.totalorder %s383_s18, %s599_s21  ;;  %p604_p3 = scmp.lt.s32.totalorder %s383_s18, %s383_s18 }
  0x2e   :  { %510 = vmatprep.subr.bf16.mxu1 %v655_v0  ;;  %v59_v25 = vld [vmem:[#allocation5 + $0x78] sm:$0xff]  ;;  %s659_s0 = smov 64   ;;  %v62_v47 = vld [vmem:[#allocation5 + $0x90] sm:$0xff]  ;;  %v64_v49 = vld [vmem:[#allocation5 + $0xa0] sm:$0xff]  ;;  %p605_p4 = scmp.lt.s32.totalorder %s603_s22, %s599_s21 }
  0x2f   :  { %500 = vmatpush3.bf16.msra.mxu0 %v499_v8  ;;  %v517_v27 = vpack.c.bf16 %v60_v26, %v59_v25  ;;  %v63_v48 = vld [vmem:[#allocation5 + $0x98] sm:$0xff]  ;;  %v65_v51 = vld [vmem:[#allocation5 + $0xa8] sm:$0xff]  ;;  %v66_v53 = vld [vmem:[#allocation5 + $0xb0] sm:$0xff] }
  0x30   :  { %501 = vmatprep.subr.bf16.mxu0 %v655_v0  ;;  %v520_v50 = vpack.c.bf16 %v63_v48, %v62_v47  ;;  %v523_v52 = vpack.c.bf16 %v65_v51, %v64_v49  ;;  %v67_v54 = vld [vmem:[#allocation5 + $0xb8] sm:$0xff]  ;;  %v68_v57 = vld [vmem:[#allocation5 + $0xc0] sm:$0xff]  ;;  %v69_v58 = vld [vmem:[#allocation5 + $0xc8] sm:$0xff]  ;;  %p606_p5 = por %p605_p4, %p604_p3 }
  0x31   :  { %512 = vmatpush3.bf16.msra.mxu1 %v511_v16  ;;  %v526_v55 = vpack.c.bf16 %v67_v54, %v66_v53  ;;  %v72_v59 = vld [vmem:[#allocation2 + $0x1] sm:$0x1]  ;;  %v529_v60 = vpack.c.bf16 %v69_v58, %v68_v57  ;;  %v70_v6 = vld [vmem:[#allocation5 + $0xd0] sm:$0x1] }
  0x32   :  { %513 = vmatprep.subr.bf16.mxu1 %v655_v0  ;;  %p607_p6 = pnand %p606_p5, %p600_p2 }
  0x33   :  { %503 = vmatpush3.bf16.msra.mxu0 %v502_v17 }
  0x34   :  { %504 = vmatprep.subr.bf16.mxu0 %v655_v0 }
  0x35   :  { %515 = vmatpush3.bf16.msra.mxu1 %v514_v22 }
  0x36   :  { %516 = vmatprep.subr.bf16.mxu1 %v655_v0 }
  0x37   :  { %506 = vmatpush3.bf16.msra.mxu0 %v505_v23 }
  0x38   :  { %519 = vmatprep.subr.bf16.mxu0 %v655_v0 }
  0x39   :  { %518 = vmatpush3.bf16.msra.mxu1 %v517_v27 }
  0x3a   :  { %455 = vmatmul.mubr.msk.f32.vlgmr.msra.gmra.mrb[0].mxu0 %vm74_vm1, %v73_v24 }
  0x3b   :  { %492 = vmatprep.mubr.msk.f32.mxu0 %vm656_vm0, %v657_v1  ;;  %521 = vmatpush3.bf16.msra.mxu0 %v520_v50 }
  0x3c   :  { %522 = vmatprep.subr.bf16.mxu0 %v655_v0 }
  0x3f   :  { %524 = vmatpush3.bf16.msra.mxu0 %v523_v52 }
  0x40   :  { %525 = vmatprep.subr.bf16.mxu0 %v655_v0 }
  0x43   :  { %527 = vmatpush3.bf16.msra.mxu0 %v526_v55 }
  0x44   :  { %528 = vmatprep.subr.bf16.mxu0 %v655_v0 }
  0x47   :  { %530 = vmatpush3.bf16.msra.mxu0 %v529_v60 }
  0x9c   :  { %v151_v32 = vpop.permute.xlu0 %150 }
 0x10d   :  { %v144_v29 = vpop.f32.mrb[0].mxu0 }
 0x10e   :  { %v145_v30 = vadd.f32 %v144_v29, %v52_v28  ;;  %v456_v31 = vpop.f32.mrb[1].mxu0 }
 0x110   :  { %v148_v33 = vmax.f32 %v145_v30, 0.0 }
 0x112   :  { %v154_v34 = vsel %vm153_vm2, %v148_v33, %v151_v32 }
 0x113   :  { %474 = vmatmul.mubr.msk.f32.vlgmr.msra.gmra.mrb[0].mxu1 %vm74_vm1, %v154_v34 }
 0x1e6   :  { %v224_v36 = vpop.f32.mrb[0].mxu1 }
 0x1e7   :  { %v225_v37 = vadd.f32 %v224_v36, %v61_v35  ;;  %v475_v38 = vpop.f32.mrb[1].mxu1 }
 0x1e9   :  { %235 = vrot.lane.b32.xlu0 %v225_v37, %s658_s2  ;;  %v408_v39 = vmul.f32 -1.442695, %v225_v37 }
 0x1eb   :  { %543 = vpow2.f32 %v408_v39 }
 0x1f5   :  { %v544_v40 = vpop.eup %543 }
 0x1f6   :  { %v231_v41 = vadd.f32 1.0, %v544_v40 }
 0x1f8   :  { %545 = vrcp.f32 %v231_v41 }
 0x202   :  { %v546_v42 = vpop.eup %545 }
 0x203   :  { %v245_v61 = vsub.f32 1.0, %v546_v42  ;;  %v251_v63 = vmul.f32 %v546_v42, %v151_v32 }
 0x25b   :  { %v236_v43 = vpop.permute.xlu0 %235 }
 0x25c   :  { %v238_v44 = vmul.f32 %v546_v42, %v236_v43 }
 0x25e   :  { %240 = vrot.lane.b32.xlu1 %v238_v44, %s659_s0 }
 0x2d0   :  { %v241_v45 = vpop.permute.xlu1 %240 }
 0x2d1   :  { %v243_v46 = vadd.f32 %v241_v45, %v225_v37 }
 0x2d3   :  { %547 = vtanh.f32 %v243_v46 }
 0x2dd   :  { %v548_v56 = vpop.eup %547 }
 0x2de   :  { %247 = vrot.lane.b32.xlu1 %v548_v56, %s660_s16 }
 0x2e2   :  { %258 = vrot.lane.b32.xlu1 %v72_v59, %s658_s2 }
 0x350   :  { %v248_v62 = vpop.permute.xlu1 %247 }
 0x351   :  { %v250_v1 = vmul.f32 %v248_v62, %v245_v61 }
 0x353   :  { %v252_v2 = vadd.f32 %v251_v63, %v250_v1 }
 0x354   :  { %v259_v3 = vpop.permute.xlu1 %258 }
 0x355   :  { %254 = vrot.lane.b32.xlu0 %v252_v2, %s660_s16 }
 0x3c7   :  { %v255_v4 = vpop.permute.xlu0 %254 }
 0x3c8   :  { %v261_v5 = vsel %vm153_vm2, %v255_v4, %v259_v3 }
 0x3c9   :  { %493 = vmatmul.mubr.msk.f32.vlgmr.msra.gmra.mrb[2].mxu0 %vm74_vm1, %v261_v5 }
 0x49c   :  { %v331_v7 = vpop.f32.mrb[2].mxu0 }
 0x49d   :  { %v332_v8 = vadd.f32 %v331_v7, %v70_v6  ;;  %v494_v0 = vpop.f32.mrb[3].mxu0 }
 0x49f   :  { %342 = vrot.lane.b32.xlu0 %v332_v8, %s658_s2  ;;  %v410_v9 = vmul.f32 -1.442695, %v332_v8 }
 0x4a1   :  { %549 = vpow2.f32 %v410_v9 }
 0x4ab   :  { %v550_v10 = vpop.eup %549 }
 0x4ac   :  { %v338_v11 = vadd.f32 1.0, %v550_v10 }
 0x4ae   :  { %551 = vrcp.f32 %v338_v11 }
 0x4b8   :  { %v552_v12 = vpop.eup %551 }
 0x4b9   :  { %v352_v18 = vsub.f32 1.0, %v552_v12  ;;  %v358_v20 = vmul.f32 %v552_v12, %v259_v3 }
 0x511   :  { %v343_v13 = vpop.permute.xlu0 %342 }
 0x512   :  { %v345_v14 = vmul.f32 %v552_v12, %v343_v13 }
 0x514   :  { %347 = vrot.lane.b32.xlu1 %v345_v14, %s659_s0 }
 0x586   :  { %v348_v15 = vpop.permute.xlu1 %347 }
 0x587   :  { %v350_v16 = vadd.f32 %v348_v15, %v332_v8 }
 0x589   :  { %553 = vtanh.f32 %v350_v16 }
 0x593   :  { %v554_v17 = vpop.eup %553 }
 0x594   :  { %354 = vrot.lane.b32.xlu0 %v554_v17, %s660_s16 }
 0x606   :  { %v355_v19 = vpop.permute.xlu0 %354 }
 0x607   :  { %v357_v21 = vmul.f32 %v355_v19, %v352_v18 }
 0x609   :  { %v359_v22 = vadd.f32 %v358_v20, %v357_v21 }
 0x60b   :  { %v366_v23 = vrot.slane %v359_v22, 7  ;;  %361 = vrot.lane.b32.xlu1 %v359_v22, %s660_s16 }
 0x60d   :  { %v369_v24 = vsel %vm368_vm3, %v252_v2, %v366_v23 }
 0x60e   :  { %371 = vrot.lane.b32.xlu0 %v369_v24, %s660_s16 }
 0x67d   :  { %v362_v25 = vpop.permute.xlu1 %361 }
 0x67e   :  { %365 = vst.msk [vmem:[#allocation7] sm:$0x1] %vm364_vm4, %v362_v25 }
 0x67f   :  { %610 = shalt.err (!%p607_p6)
}
 0x680   :  { %s611_s25 = scalar_lea.hbm %s788_s3, 16 }
 0x681   :  { %p612_p7 = scmp.ne.s32.totalorder %s788_s3, %s611_s25  ;;  %p615_p8 = scmp.lt.u32.totalorder %s611_s25, %s788_s3 }
 0x683   :  { %p617_p9 = pnand %p615_p8, %p612_p7 }
 0x685   :  { %620 = shalt.err (!%p617_p9)
}
 0x686   :  { %385 = dma.vmem_to_hbm [thread:$0]  %s383_s18, 16, %s788_s3, [#allocation4]   ;;  %v372_v26 = vpop.permute.xlu0 %371 }
 0x687   :  { %375 = vst.msk [vmem:[#allocation8] sm:$0x3] %vm374_vm5, %v372_v26  ;;  %s621_s6 = scalar_lea.vmem %s753_s20, 32  ;;  %p626_p11 = scmp.lt.s32.totalorder %s753_s20, %s753_s20 }
 0x688   :  { %p622_p10 = scmp.ne.s32.totalorder %s753_s20, %s621_s6  ;;  %p627_p12 = scmp.lt.s32.totalorder %s621_s6, %s621_s6 }
 0x68a   :  { %p628_p13 = por %p627_p12, %p626_p11 }
 0x68c   :  { %p629_p0 = pnand %p628_p13, %p622_p10 }
 0x68e   :  { %632 = shalt.err (!%p629_p0)
}
 0x68f   :  { %s633_s9 = scalar_lea.hbm %s789_s4, 32 }
 0x690   :  { %p634_p1 = scmp.ne.s32.totalorder %s789_s4, %s633_s9  ;;  %p637_p2 = scmp.lt.u32.totalorder %s633_s9, %s789_s4 }
 0x692   :  { %p639_p3 = pnand %p637_p2, %p634_p1 }
 0x694   :  { %642 = shalt.err (!%p639_p3)
}
 0x695   :  { %395 = dma.vmem_to_hbm [thread:$0]  %s753_s20, 32, %s789_s4, [#allocation9]  }
 0x696   :  { %647 = dma.done.wait [#allocation4], 16  }
 0x697   :  { %648 = vsyncadd [#allocation4], 4294967280 }
 0x698   :  { %649 = dma.done.wait [#allocation9], 32  }
 0x699   :  { %650 = vsyncadd [#allocation9], 4294967264 }
 0x69a   :  { %402 = vsyncpa [#allocation3], 1 }
 0x69b   :  { %403 = vsyncpa [#allocation6], 1 }
 0x69c   :  { %404 = vsyncpa [#allocation4], 1 }
 0x69d   :  { %405 = vsyncpa [#allocation9], 1 }

</bundles_post_ra>
